<compile_context>
chip_gen: v5e
topology: v5e:2x2
jax: 0.10.0
libtpu: 0.0.40
codegen_flags: <defaults>
</compile_context>

<pallas_src>
import jax
import jax.numpy as jnp
from jax.experimental import pallas as pl
from jax.experimental.pallas import tpu as pltpu

TE_BASE = 16

# Tile-size caps (starting points from tile sweeps); actual tiles adapt down to the
# problem size so tiny shapes are not massively over-padded.
TM_MAX = 256
TN_MAX = 256   # multiple of 128 -> lane-dense, unmasked output stores on all chips
TK_MAX = 512


def round2times(value, base):
    return (value + base - 1) // base * base


# ----------------------------- Pallas kernel ---------------------------------
def _linear_kernel(x_ref, wt_ref, b_ref, o_ref, acc_ref):
    """One (tm, tn) output tile, reduced over the k grid axis (last, 'arbitrary').

    x_ref:   (tm, tk) bf16
    wt_ref:  (tk, tn) bf16
    b_ref:   (1, tn)  f32  (index_map independent of k -> no per-k re-DMA)
    o_ref:   (tm, tn) out dtype
    acc_ref: (tm, tn) f32 scratch accumulator
    """
    k = pl.program_id(2)

    @pl.when(k == 0)
    def _():
        acc_ref[...] = jnp.zeros_like(acc_ref)

    # bf16 x bf16 -> f32 accumulation on the MXU.
    acc_ref[...] += jnp.dot(
        x_ref[...], wt_ref[...], preferred_element_type=jnp.float32
    )

    @pl.when(k == pl.num_programs(2) - 1)
    def _():
        o_ref[...] = (acc_ref[...] + b_ref[...]).astype(o_ref.dtype)


def _pallas_linear(x2d, w_t, bias_row, *, tm, tn, tk, out_dtype):
    """x2d: [M, K] bf16, w_t: [K, N] bf16, bias_row: [1, N] f32 -> [M, N] out_dtype."""
    M, K = x2d.shape
    Kw, N = w_t.shape
    assert K == Kw
    assert M % tm == 0 and K % tk == 0 and N % tn == 0

    grid = (M // tm, N // tn, K // tk)

    cost = pl.CostEstimate(
        flops=2 * M * N * K,
        transcendentals=0,
        bytes_accessed=(
            M * K * 2                       # x (bf16)
            + K * N * 2 * (M // tm)         # W re-streamed once per i tile (bf16)
            + M * N * jnp.dtype(out_dtype).itemsize
        ),
    )

    return pl.pallas_call(
        _linear_kernel,
        out_shape=jax.ShapeDtypeStruct((M, N), out_dtype),
        grid_spec=pltpu.PrefetchScalarGridSpec(
            num_scalar_prefetch=0,
            grid=grid,
            in_specs=[
                pl.BlockSpec((tm, tk), lambda i, j, k: (i, k)),
                pl.BlockSpec((tk, tn), lambda i, j, k: (k, j)),
                pl.BlockSpec((1, tn), lambda i, j, k: (0, j)),
            ],
            out_specs=pl.BlockSpec((tm, tn), lambda i, j, k: (i, j)),
            scratch_shapes=[pltpu.VMEM((tm, tn), jnp.float32)],
        ),
        compiler_params=pltpu.CompilerParams(
            dimension_semantics=("parallel", "parallel", "arbitrary"),
            # Tiles at the caps need ~2 MiB double-buffered; 32 MiB is comfortably
            # within v5e/v6e (128 MiB) and v7x (64 MiB physical) VMEM.
            vmem_limit_bytes=32 * 1024 * 1024,
        ),
        cost_estimate=cost,
    )(x2d, w_t, bias_row)


# ----------------------------- FP8Linear wrapper ------------------------------
class FP8LinearJax:
    """JAX/Pallas port of FP8Linear: pads input to multiples of 16, runs the
    (padded) linear layer, and truncates the output back to out_features."""

    def __init__(self, in_features, out_features, bias=True, dtype=jnp.float32, key=None):
        self.in_features = in_features
        self.out_features = out_features
        self.use_bias = bias

        pad_in = round2times(in_features, TE_BASE)
        pad_out = round2times(out_features, TE_BASE)
        self.pad_in = pad_in
        self.pad_out = pad_out

        if key is None:
            key = jax.random.PRNGKey(0)
        kw, kb = jax.random.split(key)
        # te.Linear weight shape: [pad_out_features, pad_in_features]
        bound = 1.0 / (pad_in ** 0.5)
        self.weight = jax.random.uniform(
            kw, (pad_out, pad_in), dtype=dtype, minval=-bound, maxval=bound
        )
        if bias:
            self.bias = jax.random.uniform(
                kb, (pad_out,), dtype=dtype, minval=-bound, maxval=bound
            )
        else:
            self.bias = jnp.zeros((pad_out,), dtype=dtype)

        # Tile sizes along K / N depend only on feature dims -> pick once here.
        self.tk = min(TK_MAX, round2times(pad_in, 128))
        self.tn = min(TN_MAX, round2times(pad_out, 128))
        self.K_k = round2times(pad_in, self.tk)
        self.N_k = round2times(pad_out, self.tn)

        # Precompute the padded, transposed, bf16 weight and padded f32 bias row
        # once (not per forward call).
        w_t = jnp.pad(
            self.weight.T.astype(jnp.float32),
            ((0, self.K_k - pad_in), (0, self.N_k - pad_out)),
        )
        self.w_t_bf16 = w_t.astype(jnp.bfloat16)
        self.bias_row = jnp.pad(
            self.bias.astype(jnp.float32), (0, self.N_k - pad_out)
        ).reshape(1, self.N_k)

    def __call__(self, x):
        shape = list(x.shape)
        assert shape[-1] == self.in_features
        x2d = x.reshape(-1, self.in_features)
        first_dim = x2d.shape[0]

        # --- FP8Linear padding semantics: rows / in_features to a multiple of 16 ---
        pad_first_dim = round2times(first_dim, TE_BASE)
        # M tile adapts to the problem size; >= 16 satisfies bf16 sublane packing.
        tm = min(TM_MAX, round2times(pad_first_dim, 16))
        M_k = round2times(pad_first_dim, tm)

        # Single fused zero-pad straight to kernel-tile shapes (zero padding, so the
        # valid output region is identical to the pad-to-16 reference).
        x_k = jnp.pad(
            x2d, ((0, M_k - first_dim), (0, self.K_k - self.in_features))
        ).astype(jnp.bfloat16)

        y = _pallas_linear(
            x_k, self.w_t_bf16, self.bias_row,
            tm=tm, tn=self.tn, tk=self.tk, out_dtype=x.dtype,
        )

        # --- truncate back (same as x[:first_dim, :out_features]) ---
        y = y[:first_dim, : self.out_features]
        shape[-1] = self.out_features
        return y.reshape(shape)


# ----------------------------------- main -------------------------------------
if __name__ == "__main__":
    key = jax.random.PRNGKey(0)
    k_x, k_p = jax.random.split(key)

    # Non-multiple-of-16 features to exercise the padding path.
    in_features, out_features = 20, 24
    batch, seq = 2, 3  # flattened first dim = 6 -> padded to 16

    x = jax.random.normal(k_x, (batch, seq, in_features), dtype=jnp.float32)

    layer = FP8LinearJax(in_features, out_features, bias=True, key=k_p)

    y = layer(x)
    y = jax.block_until_ready(y)

    # Reference (plain JAX, f32): y = x @ W[:out, :in].T + b[:out]
    w_eff = layer.weight[:out_features, :in_features]
    b_eff = layer.bias[:out_features]
    y_ref = jnp.einsum("bsi,oi->bso", x, w_eff) + b_eff

    assert y.shape == (batch, seq, out_features)
    # bf16 MXU inputs (f32 accumulation) -> loosened tolerance vs the f32 reference.
    assert jnp.allclose(y, y_ref, atol=3e-2, rtol=3e-2)

    print("KERNEL_OK")
</pallas_src>

<mosaic_0001>
module attributes {stable_mosaic.version = 11 : i64} {
  func.func @_linear_kernel(%arg0: i32, %arg1: i32, %arg2: i32, %arg3: memref<16x128xbf16, #tpu.memory_space<vmem>>, %arg4: memref<128x128xbf16, #tpu.memory_space<vmem>>, %arg5: memref<1x128xf32, #tpu.memory_space<vmem>>, %arg6: memref<16x128xf32, #tpu.memory_space<vmem>>, %arg7: memref<16x128xf32, #tpu.memory_space<vmem>>) attributes {dimension_semantics = [#tpu.dimension_semantics<parallel>, #tpu.dimension_semantics<parallel>, #tpu.dimension_semantics<arbitrary>], iteration_bounds = array<i64: 1, 1, 1>, scalar_prefetch = 0 : i64, scratch_operands = 1 : i64, tpu.core_type = #tpu.core_type<tc>, window_params = [{transform_indices = @transform_0, window_bounds = array<i64: 16, 128>}, {transform_indices = @transform_1, window_bounds = array<i64: 128, 128>}, {transform_indices = @transform_2, window_bounds = array<i64: 1, 128>}, {transform_indices = @transform_3, window_bounds = array<i64: 16, 128>}]} {
    %c0_i32 = arith.constant 0 : i32
    %0 = arith.cmpi eq, %arg2, %c0_i32 : i32
    %1 = arith.extui %0 : i1 to i32
    %c0_i32_0 = arith.constant 0 : i32
    %2 = arith.cmpi ne, %1, %c0_i32_0 : i32
    scf.if %2 {
      %cst_10 = arith.constant 0.000000e+00 : f32
      %12 = vector.broadcast %cst_10 : f32 to vector<16x128xf32>
      %c0_11 = arith.constant 0 : index
      %c0_12 = arith.constant 0 : index
      %13 = vector.load %arg7[%c0_11, %c0_12] : memref<16x128xf32, #tpu.memory_space<vmem>>, vector<16x128xf32>
      tpu.vector_store %arg7[%c0_11, %c0_12], %12 {strides = array<i32>} : memref<16x128xf32, #tpu.memory_space<vmem>>, vector<16x128xf32>,
    } else {
    }
    %c0 = arith.constant 0 : index
    %c0_1 = arith.constant 0 : index
    %3 = vector.load %arg7[%c0, %c0_1] : memref<16x128xf32, #tpu.memory_space<vmem>>, vector<16x128xf32>
    %c0_2 = arith.constant 0 : index
    %c0_3 = arith.constant 0 : index
    %4 = vector.load %arg3[%c0_2, %c0_3] : memref<16x128xbf16, #tpu.memory_space<vmem>>, vector<16x128xbf16>
    %c0_4 = arith.constant 0 : index
    %c0_5 = arith.constant 0 : index
    %5 = vector.load %arg4[%c0_4, %c0_5] : memref<128x128xbf16, #tpu.memory_space<vmem>>, vector<128x128xbf16>
    %cst = arith.constant dense<0.000000e+00> : vector<16x128xf32>
    %6 = tpu.matmul %4, %5, %cst {dimension_numbers = #tpu.dot_dimension_numbers<[1], [0], [0], [1], [0, 0, 1, 1], [], []>} : vector<16x128xbf16>, vector<128x128xbf16>, vector<16x128xf32> -> vector<16x128xf32>
    %7 = arith.addf %3, %6 : vector<16x128xf32>
    %c0_6 = arith.constant 0 : index
    %c0_7 = arith.constant 0 : index
    %8 = vector.load %arg7[%c0_6, %c0_7] : memref<16x128xf32, #tpu.memory_space<vmem>>, vector<16x128xf32>
    tpu.vector_store %arg7[%c0_6, %c0_7], %7 {strides = array<i32>} : memref<16x128xf32, #tpu.memory_space<vmem>>, vector<16x128xf32>,
    %c0_i32_8 = arith.constant 0 : i32
    %9 = arith.cmpi eq, %arg2, %c0_i32_8 : i32
    %10 = arith.extui %9 : i1 to i32
    %c0_i32_9 = arith.constant 0 : i32
    %11 = arith.cmpi ne, %10, %c0_i32_9 : i32
    scf.if %11 {
      %c0_10 = arith.constant 0 : index
      %c0_11 = arith.constant 0 : index
      %12 = vector.load %arg7[%c0_10, %c0_11] : memref<16x128xf32, #tpu.memory_space<vmem>>, vector<16x128xf32>
      %c0_12 = arith.constant 0 : index
      %c0_13 = arith.constant 0 : index
      %13 = vector.load %arg5[%c0_12, %c0_13] : memref<1x128xf32, #tpu.memory_space<vmem>>, vector<1x128xf32>
      %14 = vector.broadcast %13 : vector<1x128xf32> to vector<16x128xf32>
      %15 = arith.addf %12, %14 : vector<16x128xf32>
      %c0_14 = arith.constant 0 : index
      %c0_15 = arith.constant 0 : index
      %16 = vector.load %arg6[%c0_14, %c0_15] : memref<16x128xf32, #tpu.memory_space<vmem>>, vector<16x128xf32>
      tpu.vector_store %arg6[%c0_14, %c0_15], %15 {strides = array<i32>} : memref<16x128xf32, #tpu.memory_space<vmem>>, vector<16x128xf32>,
    } else {
    }
    return
  }
  func.func @transform_0(%arg0: i32, %arg1: i32, %arg2: i32) -> (i32, i32) {
    %c0_i32 = arith.constant 0 : i32
    return %arg0, %arg2 : i32, i32
  }
  func.func @transform_1(%arg0: i32, %arg1: i32, %arg2: i32) -> (i32, i32) {
    %c0_i32 = arith.constant 0 : i32
    return %arg2, %arg1 : i32, i32
  }
  func.func @transform_2(%arg0: i32, %arg1: i32, %arg2: i32) -> (i32, i32) {
    %c0_i32 = arith.constant 0 : i32
    %c0_i32_0 = arith.constant 0 : i32
    return %c0_i32, %arg1 : i32, i32
  }
  func.func @transform_3(%arg0: i32, %arg1: i32, %arg2: i32) -> (i32, i32) {
    %c0_i32 = arith.constant 0 : i32
    return %arg0, %arg1 : i32, i32
  }
}

</mosaic_0001>

<bundles_post_ra>
// kernel: tpu_custom_call.1
= control target key start
LH: loop header
LB: loop body
LE: loop exit
PB: predicated region body
PF: predicated region fallthrough
CT: control target
= control target key end

     0   :  { %8 = vsyncpa [#allocation4], 0  ;;  %s348_s0 = inlined_call_operand.hbm [shape: bf16[16,128], index: 0, kind: input, shape index: {}]   ;;  %s349_s1 = inlined_call_operand.hbm [shape: bf16[128,128], index: 1, kind: input, shape index: {}]   ;;  %s350_s2 = inlined_call_operand.vmem [shape: f32[1,128], index: 2, kind: input, shape index: {}]   ;;  %s351_s3 = inlined_call_operand.hbm [shape: f32[16,128], index: 3, kind: output, shape index: {}]  }
   0x1   :  { %9 = vsyncpa [#allocation7], 0 }
   0x2   :  { %10 = vsyncpa [#allocation5], 0  ;;  %s15_s14 = sshll.u32 %s348_s0, 4  ;;  %s309_s15 = smov [#allocation3]   ;;  %s16_s14 = int_to_ptr.hbm [resolvable:$true] %s15_s14 }
   0x3   :  { %s17_s16 = sshll.u32 %s309_s15, 4  ;;  %s28_s19 = sshll.u32 %s349_s1, 4  ;;  %s18_s16 = int_to_ptr.vmem [resolvable:$true] %s17_s16  ;;  %s29_s19 = int_to_ptr.hbm [resolvable:$true] %s28_s19 }
   0x4   :  { %s310_s20 = smov 64   ;;  %s311_s21 = smov 4  }
   0x5   :  { %23 = dma.hbm_to_vmem [thread:$0]  %s16_s14, 128, %s18_s16, [#allocation4], %s310_s20, %s310_s20, %s311_s21  }
   0x6   :  { %s312_s22 = smov [#allocation6]  }
   0x7   :  { %s30_s23 = sshll.u32 %s312_s22, 4  ;;  %s31_s23 = int_to_ptr.vmem [resolvable:$true] %s30_s23 }
   0x8   :  { %36 = dma.hbm_to_vmem [thread:$0]  %s29_s19, 1024, %s31_s23, [#allocation7], %s310_s20, %s310_s20, %s311_s21  }
   0x9   :  { %303 = dma.done.wait [#allocation4], 128  }
   0xa   :  { %304 = vsyncadd [#allocation4], 4294967168 }
   0xb   :  { %305 = dma.done.wait [#allocation7], 1024  }
   0xc   :  { %306 = vsyncadd [#allocation7], 4294966272  ;;  %v222_v0 = vld [vmem:[#allocation6 + $0x38] sm:$0xff]  ;;  %v221_v1 = vld [vmem:[#allocation6 + $0x30] sm:$0xff]  ;;  %s313_s24 = smov [#allocation8]   ;;  %s164_s28 = sshll.u32 %s351_s3, 4  ;;  %s165_s28 = int_to_ptr.hbm [resolvable:$true] %s164_s28 }
   0xd   :  { %127 = vmatpush.bf16.msra.mxu0 %v222_v0  ;;  %v220_v2 = vld [vmem:[#allocation6 + $0x28] sm:$0xff]  ;;  %v219_v3 = vld [vmem:[#allocation6 + $0x20] sm:$0xff]  ;;  %v218_v4 = vld [vmem:[#allocation6 + $0x18] sm:$0xff]  ;;  %s162_s25 = sshll.u32 %s313_s24, 4  ;;  %s314_s29 = smov 128   ;;  %s163_s25 = int_to_ptr.vmem [resolvable:$true] %s162_s25 }
   0xe   :  { %v217_v5 = vld [vmem:[#allocation6 + $0x10] sm:$0xff]  ;;  %v216_v6 = vld [vmem:[#allocation6 + $0x8] sm:$0xff]  ;;  %v215_v7 = vld [vmem:[#allocation6] sm:$0xff]  ;;  %s315_s30 = smov 8  }
   0xf   :  { %v214_v8 = vld [vmem:[#allocation3] sm:$0xff] }
  0x10   :  { %v230_v9 = vld [vmem:[%s350_s2] ss:$0 sm:$0xff] }
  0x11   :  { %128 = vmatpush.bf16.msra.mxu0 %v221_v1 }
  0x15   :  { %129 = vmatpush.bf16.msra.mxu0 %v220_v2 }
  0x19   :  { %130 = vmatpush.bf16.msra.mxu0 %v219_v3 }
  0x1d   :  { %131 = vmatpush.bf16.msra.mxu0 %v218_v4 }
  0x21   :  { %132 = vmatpush.bf16.msra.mxu0 %v217_v5 }
  0x25   :  { %133 = vmatpush.bf16.msra.mxu0 %v216_v6 }
  0x29   :  { %134 = vmatpush.bf16.msra.mxu0 %v215_v7 }
  0x2c   :  { %135 = vmatmul.bf16.vlgmr.msra.gmra.mxu0 %v214_v8 }
  0xa9   :  { %v136_v10 = vpop.f32.mrf.mxu0 }
  0xaa   :  { %v154_v11 = vadd.f32 %v230_v9, %v136_v10 }
  0xac   :  { %156 = vst [vmem:[#allocation8] sm:$0xff] %v154_v11 }
  0xb1   :  { %v138_v12 = vpop.f32.mrf.mxu0 }
  0xb2   :  { %v155_v13 = vadd.f32 %v230_v9, %v138_v12 }
  0xb4   :  { %157 = vst [vmem:[#allocation8 + $0x8] sm:$0xff] %v155_v13 }
  0xb5   :  { %170 = dma.vmem_to_hbm [thread:$0]  %s163_s25, 256, %s165_s28, [#allocation5], %s314_s29, %s314_s29, %s315_s30  }
  0xb6   :  { %307 = dma.done.wait [#allocation5], 256  }
  0xb7   :  { %308 = vsyncadd [#allocation5], 4294967040 }
  0xb8   :  { %175 = vsyncpa [#allocation4], 1 }
  0xb9   :  { %176 = vsyncpa [#allocation7], 1 }
  0xba   :  { %177 = vsyncpa [#allocation5], 1 }

</bundles_post_ra>
